<compile_context>
chip_gen: v5e
topology: v5e:2x2
jax: 0.10.0
libtpu: 0.0.40
codegen_flags: <defaults>
</compile_context>

<pallas_src>
import math

import jax
import jax.numpy as jnp
from jax.experimental import pallas as pl
from jax.experimental.pallas import tpu as pltpu

LANE = 128


def _round_up(x, m):
    return ((x + m - 1) // m) * m


def _leaky_relu(v, slope=0.01):
    # nn.LeakyReLU default negative_slope = 0.01
    return jnp.where(v >= 0, v, slope * v)


def autoencoder_kernel(x_ref,
                       w1_ref, b1_ref, w2_ref, b2_ref,   # encoder MLPBlock
                       w3_ref, b3_ref, w4_ref, b4_ref,   # decoder MLPBlock
                       out_ref):
    cdt = w1_ref.dtype                                    # compute (MXU) dtype, bf16
    x = x_ref[...]                                        # [TM, Dp] bf16
    # ---- encoder: Linear -> LeakyReLU -> Linear -> z ----
    h1 = jnp.dot(x, w1_ref[...], preferred_element_type=jnp.float32) + b1_ref[...]
    h1 = _leaky_relu(h1)                                  # fp32, VPU
    z = jnp.dot(h1.astype(cdt), w2_ref[...],
                preferred_element_type=jnp.float32) + b2_ref[...]
    # ---- decoder: Linear -> LeakyReLU -> Linear -> x_hat ----
    h2 = jnp.dot(z.astype(cdt), w3_ref[...],
                 preferred_element_type=jnp.float32) + b3_ref[...]
    h2 = _leaky_relu(h2)
    x_hat = jnp.dot(h2.astype(cdt), w4_ref[...],
                    preferred_element_type=jnp.float32) + b4_ref[...]
    out_ref[...] = x_hat.astype(out_ref.dtype)


def autoencoder_forward(x_nchw, params, *, compute_dtype=jnp.bfloat16, tm=None):
    """x_nchw: [B, C, H, W] float32 -> x_hat: [B, C, H, W] float32."""
    B, C, H, W = x_nchw.shape
    D = C * H * W
    w1, b1, w2, b2, w3, b3, w4, b4 = params
    hidden, latent = w1.shape[1], w2.shape[1]

    # Lane-dense padded sizes (multiples of 128); zero-padding is exact here.
    Dp = _round_up(D, LANE)
    Hp = _round_up(hidden, LANE)
    Lp = _round_up(latent, LANE)

    # Batch tile: 256 fills the v6e/v7x MXU M dimension (use tm=128 on v5e);
    # for tiny batches just round up to the 8-sublane minimum.
    if tm is None:
        tm = min(256, _round_up(B, 8))
    Bp = _round_up(B, tm)

    # ---- pad + cast operands (plain-JAX glue, layout only) ----
    x2d = x_nchw.reshape(B, D).astype(compute_dtype)
    x2d = jnp.pad(x2d, ((0, Bp - B), (0, Dp - D)))

    def pad_w(w, rows, cols):
        return jnp.pad(w, ((0, rows - w.shape[0]),
                           (0, cols - w.shape[1]))).astype(compute_dtype)

    def pad_b(b, cols):
        return jnp.pad(b, ((0, 0), (0, cols - b.shape[1]))).astype(jnp.float32)

    w1p, b1p = pad_w(w1, Dp, Hp), pad_b(b1, Hp)
    w2p, b2p = pad_w(w2, Hp, Lp), pad_b(b2, Lp)
    w3p, b3p = pad_w(w3, Lp, Hp), pad_b(b3, Hp)
    w4p, b4p = pad_w(w4, Hp, Dp), pad_b(b4, Dp)

    grid = (pl.cdiv(Bp, tm),)

    def const_spec(a):
        # Full-array block, constant block index -> stays VMEM resident across
        # all batch tiles (no re-DMA).  Explicitly bind ndim (no late-binding bug).
        nd = a.ndim
        return pl.BlockSpec(a.shape, lambda i, _nd=nd: (0,) * _nd)

    in_specs = [
        pl.BlockSpec((tm, Dp), lambda i: (i, 0)),          # x: advances with grid
        const_spec(w1p), const_spec(b1p),
        const_spec(w2p), const_spec(b2p),
        const_spec(w3p), const_spec(b3p),
        const_spec(w4p), const_spec(b4p),
    ]
    out_spec = pl.BlockSpec((tm, Dp), lambda i: (i, 0))

    # ---- explicit VMEM budget (safe on v7x's 64 MiB physical VMEM) ----
    csz = jnp.dtype(compute_dtype).itemsize
    weight_bytes = (Dp * Hp + Hp * Lp + Lp * Hp + Hp * Dp) * csz
    bias_bytes = (Hp + Lp + Hp + Dp) * 4
    act_bytes = 2 * (tm * Dp * csz + tm * Dp * 4)          # double-buffered in/out
    interm_bytes = tm * (Hp + Lp + Hp + Dp) * 4            # fp32 intermediates
    vmem_need = 2 * (weight_bytes + bias_bytes) + act_bytes + interm_bytes
    vmem_limit = int(min(64 * 1024 * 1024,
                         max(32 * 1024 * 1024, vmem_need + (4 << 20))))

    x_hat_2d = pl.pallas_call(
        autoencoder_kernel,
        out_shape=jax.ShapeDtypeStruct((Bp, Dp), jnp.float32),
        grid=grid,
        in_specs=in_specs,
        out_specs=out_spec,
        compiler_params=pltpu.CompilerParams(
            dimension_semantics=("parallel",),
            vmem_limit_bytes=vmem_limit,
        ),
    )(x2d, w1p, b1p, w2p, b2p, w3p, b3p, w4p, b4p)

    return x_hat_2d[:B, :D].reshape(B, C, H, W)


def init_params(key, d_in, hidden, latent):
    """Deterministic synthetic weights.  Linear stored as (in, out); bias as (1, out)."""
    ks = jax.random.split(key, 8)

    def lin(kw, kb, fan_in, fan_out):
        bound = 1.0 / math.sqrt(fan_in)
        w = jax.random.uniform(kw, (fan_in, fan_out), jnp.float32, -bound, bound)
        b = jax.random.uniform(kb, (1, fan_out), jnp.float32, -bound, bound)
        return w, b

    w1, b1 = lin(ks[0], ks[1], d_in, hidden)     # encoder layer 1
    w2, b2 = lin(ks[2], ks[3], hidden, latent)   # encoder layer 2 -> latent
    w3, b3 = lin(ks[4], ks[5], latent, hidden)   # decoder layer 1
    w4, b4 = lin(ks[6], ks[7], hidden, d_in)     # decoder layer 2 -> reconstruction
    return (w1, b1, w2, b2, w3, b3, w4, b4)


def reference_forward(x_nchw, params, compute_dtype=jnp.bfloat16):
    """Pure-JAX reference with the same bf16-compute / fp32-accumulate numerics."""
    B, C, H, W = x_nchw.shape
    x = x_nchw.reshape(B, -1)
    w1, b1, w2, b2, w3, b3, w4, b4 = params

    def lin(a, w, b):
        return jnp.dot(a.astype(compute_dtype), w.astype(compute_dtype),
                       preferred_element_type=jnp.float32) + b.astype(jnp.float32)

    h1 = _leaky_relu(lin(x, w1, b1))
    z = lin(h1, w2, b2)
    h2 = _leaky_relu(lin(z, w3, b3))
    x_hat = lin(h2, w4, b4)
    return x_hat.reshape(B, C, H, W).astype(jnp.float32)


if __name__ == "__main__":
    key = jax.random.PRNGKey(0)
    k_x, k_p = jax.random.split(key)

    # Small shapes consistent with the module's forward (image-like NCHW input).
    B, C, H, W = 2, 4, 16, 16
    HIDDEN, LATENT = 64, 32
    D = C * H * W

    x = jax.random.normal(k_x, (B, C, H, W), dtype=jnp.float32)
    params = init_params(k_p, D, HIDDEN, LATENT)

    x_hat = autoencoder_forward(x, params)
    x_hat = jax.block_until_ready(x_hat)

    # Sanity-check against the pure-JAX reference (same bf16/fp32 numerics).
    ref = reference_forward(x, params)
    assert x_hat.shape == (B, C, H, W)
    assert jnp.allclose(x_hat, ref, atol=2e-2, rtol=2e-2), "mismatch vs reference"

    print("KERNEL_OK")
</pallas_src>

<mosaic_0001>
module attributes {stable_mosaic.version = 11 : i64} {
  func.func @autoencoder_kernel(%arg0: i32, %arg1: memref<8x1024xbf16, #tpu.memory_space<vmem>>, %arg2: memref<1024x128xbf16, #tpu.memory_space<vmem>>, %arg3: memref<1x128xf32, #tpu.memory_space<vmem>>, %arg4: memref<128x128xbf16, #tpu.memory_space<vmem>>, %arg5: memref<1x128xf32, #tpu.memory_space<vmem>>, %arg6: memref<128x128xbf16, #tpu.memory_space<vmem>>, %arg7: memref<1x128xf32, #tpu.memory_space<vmem>>, %arg8: memref<128x1024xbf16, #tpu.memory_space<vmem>>, %arg9: memref<1x1024xf32, #tpu.memory_space<vmem>>, %arg10: memref<8x1024xf32, #tpu.memory_space<vmem>>) attributes {dimension_semantics = [#tpu.dimension_semantics<parallel>], iteration_bounds = array<i64: 1>, scalar_prefetch = 0 : i64, scratch_operands = 0 : i64, tpu.core_type = #tpu.core_type<tc>, window_params = [{transform_indices = @transform_0, window_bounds = array<i64: 8, 1024>}, {pipeline_mode = #tpu.pipeline_mode<synchronous>, transform_indices = @transform_1, window_bounds = array<i64: 1024, 128>}, {pipeline_mode = #tpu.pipeline_mode<synchronous>, transform_indices = @transform_2, window_bounds = array<i64: 1, 128>}, {pipeline_mode = #tpu.pipeline_mode<synchronous>, transform_indices = @transform_3, window_bounds = array<i64: 128, 128>}, {pipeline_mode = #tpu.pipeline_mode<synchronous>, transform_indices = @transform_4, window_bounds = array<i64: 1, 128>}, {pipeline_mode = #tpu.pipeline_mode<synchronous>, transform_indices = @transform_5, window_bounds = array<i64: 128, 128>}, {pipeline_mode = #tpu.pipeline_mode<synchronous>, transform_indices = @transform_6, window_bounds = array<i64: 1, 128>}, {pipeline_mode = #tpu.pipeline_mode<synchronous>, transform_indices = @transform_7, window_bounds = array<i64: 128, 1024>}, {pipeline_mode = #tpu.pipeline_mode<synchronous>, transform_indices = @transform_8, window_bounds = array<i64: 1, 1024>}, {transform_indices = @transform_9, window_bounds = array<i64: 8, 1024>}]} {
    %c0 = arith.constant 0 : index
    %c0_0 = arith.constant 0 : index
    %0 = vector.load %arg1[%c0, %c0_0] : memref<8x1024xbf16, #tpu.memory_space<vmem>>, vector<8x1024xbf16>
    %c0_1 = arith.constant 0 : index
    %c0_2 = arith.constant 0 : index
    %1 = vector.load %arg2[%c0_1, %c0_2] : memref<1024x128xbf16, #tpu.memory_space<vmem>>, vector<1024x128xbf16>
    %cst = arith.constant dense<0.000000e+00> : vector<8x128xf32>
    %2 = tpu.matmul %0, %1, %cst {dimension_numbers = #tpu.dot_dimension_numbers<[1], [0], [0], [1], [0, 0, 1, 1], [], []>} : vector<8x1024xbf16>, vector<1024x128xbf16>, vector<8x128xf32> -> vector<8x128xf32>
    %c0_3 = arith.constant 0 : index
    %c0_4 = arith.constant 0 : index
    %3 = vector.load %arg3[%c0_3, %c0_4] : memref<1x128xf32, #tpu.memory_space<vmem>>, vector<1x128xf32>
    %4 = vector.broadcast %3 : vector<1x128xf32> to vector<8x128xf32>
    %5 = arith.addf %2, %4 : vector<8x128xf32>
    %cst_5 = arith.constant 0.000000e+00 : f32
    %6 = vector.broadcast %cst_5 : f32 to vector<8x128xf32>
    %7 = arith.cmpf oge, %5, %6 : vector<8x128xf32>
    %cst_6 = arith.constant 0.00999999977 : f32
    %8 = vector.broadcast %cst_6 : f32 to vector<8x128xf32>
    %9 = arith.mulf %8, %5 : vector<8x128xf32>
    %10 = arith.select %7, %5, %9 : vector<8x128xi1>, vector<8x128xf32>
    %11 = arith.truncf %10 : vector<8x128xf32> to vector<8x128xbf16>
    %c0_7 = arith.constant 0 : index
    %c0_8 = arith.constant 0 : index
    %12 = vector.load %arg4[%c0_7, %c0_8] : memref<128x128xbf16, #tpu.memory_space<vmem>>, vector<128x128xbf16>
    %cst_9 = arith.constant dense<0.000000e+00> : vector<8x128xf32>
    %13 = tpu.matmul %11, %12, %cst_9 {dimension_numbers = #tpu.dot_dimension_numbers<[1], [0], [0], [1], [0, 0, 1, 1], [], []>} : vector<8x128xbf16>, vector<128x128xbf16>, vector<8x128xf32> -> vector<8x128xf32>
    %c0_10 = arith.constant 0 : index
    %c0_11 = arith.constant 0 : index
    %14 = vector.load %arg5[%c0_10, %c0_11] : memref<1x128xf32, #tpu.memory_space<vmem>>, vector<1x128xf32>
    %15 = vector.broadcast %14 : vector<1x128xf32> to vector<8x128xf32>
    %16 = arith.addf %13, %15 : vector<8x128xf32>
    %17 = arith.truncf %16 : vector<8x128xf32> to vector<8x128xbf16>
    %c0_12 = arith.constant 0 : index
    %c0_13 = arith.constant 0 : index
    %18 = vector.load %arg6[%c0_12, %c0_13] : memref<128x128xbf16, #tpu.memory_space<vmem>>, vector<128x128xbf16>
    %cst_14 = arith.constant dense<0.000000e+00> : vector<8x128xf32>
    %19 = tpu.matmul %17, %18, %cst_14 {dimension_numbers = #tpu.dot_dimension_numbers<[1], [0], [0], [1], [0, 0, 1, 1], [], []>} : vector<8x128xbf16>, vector<128x128xbf16>, vector<8x128xf32> -> vector<8x128xf32>
    %c0_15 = arith.constant 0 : index
    %c0_16 = arith.constant 0 : index
    %20 = vector.load %arg7[%c0_15, %c0_16] : memref<1x128xf32, #tpu.memory_space<vmem>>, vector<1x128xf32>
    %21 = vector.broadcast %20 : vector<1x128xf32> to vector<8x128xf32>
    %22 = arith.addf %19, %21 : vector<8x128xf32>
    %cst_17 = arith.constant 0.000000e+00 : f32
    %23 = vector.broadcast %cst_17 : f32 to vector<8x128xf32>
    %24 = arith.cmpf oge, %22, %23 : vector<8x128xf32>
    %cst_18 = arith.constant 0.00999999977 : f32
    %25 = vector.broadcast %cst_18 : f32 to vector<8x128xf32>
    %26 = arith.mulf %25, %22 : vector<8x128xf32>
    %27 = arith.select %24, %22, %26 : vector<8x128xi1>, vector<8x128xf32>
    %28 = arith.truncf %27 : vector<8x128xf32> to vector<8x128xbf16>
    %c0_19 = arith.constant 0 : index
    %c0_20 = arith.constant 0 : index
    %29 = vector.load %arg8[%c0_19, %c0_20] : memref<128x1024xbf16, #tpu.memory_space<vmem>>, vector<128x1024xbf16>
    %cst_21 = arith.constant dense<0.000000e+00> : vector<8x1024xf32>
    %30 = tpu.matmul %28, %29, %cst_21 {dimension_numbers = #tpu.dot_dimension_numbers<[1], [0], [0], [1], [0, 0, 1, 1], [], []>} : vector<8x128xbf16>, vector<128x1024xbf16>, vector<8x1024xf32> -> vector<8x1024xf32>
    %c0_22 = arith.constant 0 : index
    %c0_23 = arith.constant 0 : index
    %31 = vector.load %arg9[%c0_22, %c0_23] : memref<1x1024xf32, #tpu.memory_space<vmem>>, vector<1x1024xf32>
    %32 = vector.broadcast %31 : vector<1x1024xf32> to vector<8x1024xf32>
    %33 = arith.addf %30, %32 : vector<8x1024xf32>
    %c0_24 = arith.constant 0 : index
    %c0_25 = arith.constant 0 : index
    %34 = vector.load %arg10[%c0_24, %c0_25] : memref<8x1024xf32, #tpu.memory_space<vmem>>, vector<8x1024xf32>
    tpu.vector_store %arg10[%c0_24, %c0_25], %33 {strides = array<i32>} : memref<8x1024xf32, #tpu.memory_space<vmem>>, vector<8x1024xf32>,
    return
  }
  func.func @transform_0(%arg0: i32) -> (i32, i32) {
    %c0_i32 = arith.constant 0 : i32
    %c0_i32_0 = arith.constant 0 : i32
    return %arg0, %c0_i32 : i32, i32
  }
  func.func @transform_1(%arg0: i32) -> (i32, i32) {
    %c0_i32 = arith.constant 0 : i32
    %c0_i32_0 = arith.constant 0 : i32
    %c0_i32_1 = arith.constant 0 : i32
    return %c0_i32, %c0_i32_0 : i32, i32
  }
  func.func @transform_2(%arg0: i32) -> (i32, i32) {
    %c0_i32 = arith.constant 0 : i32
    %c0_i32_0 = arith.constant 0 : i32
    %c0_i32_1 = arith.constant 0 : i32
    return %c0_i32, %c0_i32_0 : i32, i32
  }
  func.func @transform_3(%arg0: i32) -> (i32, i32) {
    %c0_i32 = arith.constant 0 : i32
    %c0_i32_0 = arith.constant 0 : i32
    %c0_i32_1 = arith.constant 0 : i32
    return %c0_i32, %c0_i32_0 : i32, i32
  }
  func.func @transform_4(%arg0: i32) -> (i32, i32) {
    %c0_i32 = arith.constant 0 : i32
    %c0_i32_0 = arith.constant 0 : i32
    %c0_i32_1 = arith.constant 0 : i32
    return %c0_i32, %c0_i32_0 : i32, i32
  }
  func.func @transform_5(%arg0: i32) -> (i32, i32) {
    %c0_i32 = arith.constant 0 : i32
    %c0_i32_0 = arith.constant 0 : i32
    %c0_i32_1 = arith.constant 0 : i32
    return %c0_i32, %c0_i32_0 : i32, i32
  }
  func.func @transform_6(%arg0: i32) -> (i32, i32) {
    %c0_i32 = arith.constant 0 : i32
    %c0_i32_0 = arith.constant 0 : i32
    %c0_i32_1 = arith.constant 0 : i32
    return %c0_i32, %c0_i32_0 : i32, i32
  }
  func.func @transform_7(%arg0: i32) -> (i32, i32) {
    %c0_i32 = arith.constant 0 : i32
    %c0_i32_0 = arith.constant 0 : i32
    %c0_i32_1 = arith.constant 0 : i32
    return %c0_i32, %c0_i32_0 : i32, i32
  }
  func.func @transform_8(%arg0: i32) -> (i32, i32) {
    %c0_i32 = arith.constant 0 : i32
    %c0_i32_0 = arith.constant 0 : i32
    %c0_i32_1 = arith.constant 0 : i32
    return %c0_i32, %c0_i32_0 : i32, i32
  }
  func.func @transform_9(%arg0: i32) -> (i32, i32) {
    %c0_i32 = arith.constant 0 : i32
    %c0_i32_0 = arith.constant 0 : i32
    return %arg0, %c0_i32 : i32, i32
  }
}

</mosaic_0001>

<bundles_post_ra>
// kernel: tpu_custom_call.1
= control target key start
LH: loop header
LB: loop body
LE: loop exit
PB: predicated region body
PF: predicated region fallthrough
CT: control target
= control target key end

     0   :  { %14 = vsyncpa [#allocation3], 0  ;;  %s2483_s0 = inlined_call_operand.hbm [shape: bf16[8,1024], index: 0, kind: input, shape index: {}]   ;;  %s2484_s1 = inlined_call_operand.hbm [shape: bf16[1024,128], index: 1, kind: input, shape index: {}]   ;;  %s2485_s2 = inlined_call_operand.vmem [shape: f32[1,128], index: 2, kind: input, shape index: {}]   ;;  %s2486_s3 = inlined_call_operand.hbm [shape: bf16[128,128], index: 3, kind: input, shape index: {}]   ;;  %s2487_s4 = inlined_call_operand.vmem [shape: f32[1,128], index: 4, kind: input, shape index: {}]   ;;  %s2488_s5 = inlined_call_operand.hbm [shape: bf16[128,128], index: 5, kind: input, shape index: {}]   ;;  %s2489_s6 = inlined_call_operand.vmem [shape: f32[1,128], index: 6, kind: input, shape index: {}]   ;;  %s2490_s7 = inlined_call_operand.hbm [shape: bf16[128,1024], index: 7, kind: input, shape index: {}]   ;;  %s2491_s8 = inlined_call_operand.hbm [shape: f32[1,1024], index: 8, kind: input, shape index: {}]   ;;  %s2492_s9 = inlined_call_operand.hbm [shape: f32[8,1024], index: 9, kind: output, shape index: {}]  }
   0x1   :  { %15 = vsyncpa [#allocation6], 0 }
   0x2   :  { %16 = vsyncpa [#allocation9], 0 }
   0x3   :  { %17 = vsyncpa [#allocation12], 0  ;;  %s34_s11 = sshll.u32 %s2484_s1, 4  ;;  %s35_s11 = int_to_ptr.hbm [resolvable:$true] %s34_s11 }
   0x4   :  { %18 = vsyncpa [#allocation4], 0  ;;  %s2392_s12 = smov [#allocation5]   ;;  %s64_s16 = sshll.u32 %s2488_s5, 4  ;;  %s65_s16 = int_to_ptr.hbm [resolvable:$true] %s64_s16 }
   0x5   :  { %s36_s13 = sshll.u32 %s2392_s12, 4  ;;  %s2393_s17 = smov 64   ;;  %s37_s13 = int_to_ptr.vmem [resolvable:$true] %s36_s13 }
   0x6   :  { %s2394_s18 = smov 4   ;;  %s2395_s19 = smov [#allocation8]  }
   0x7   :  { %42 = dma.hbm_to_vmem [thread:$0]  %s35_s11, 8192, %s37_s13, [#allocation6], %s2393_s17, %s2393_s17, %s2394_s18  }
   0x8   :  { %s66_s20 = sshll.u32 %s2395_s19, 4  ;;  %s24_s23 = sshll.u32 %s2483_s0, 4  ;;  %s67_s20 = int_to_ptr.vmem [resolvable:$true] %s66_s20  ;;  %s25_s23 = int_to_ptr.hbm [resolvable:$true] %s24_s23 }
   0x9   :  { %72 = dma.hbm_to_vmem [thread:$0]  %s65_s16, 1024, %s67_s20, [#allocation9], %s2393_s17, %s2393_s17, %s2394_s18  }
   0xa   :  { %s49_s25 = sshll.u32 %s2486_s3, 4  ;;  %s2396_s26 = smov [#allocation2]   ;;  %s50_s25 = int_to_ptr.hbm [resolvable:$true] %s49_s25 }
   0xb   :  { %s26_s27 = sshll.u32 %s2396_s26, 4  ;;  %s2397_s5 = smov [#allocation7]   ;;  %s27_s27 = int_to_ptr.vmem [resolvable:$true] %s26_s27 }
   0xc   :  { %29 = dma.hbm_to_vmem [thread:$0]  %s25_s23, 512, %s27_s27, [#allocation3]  }
   0xd   :  { %s51_s28 = sshll.u32 %s2397_s5, 4  ;;  %s79_s10 = sshll.u32 %s2490_s7, 4  ;;  %s52_s28 = int_to_ptr.vmem [resolvable:$true] %s51_s28  ;;  %s80_s10 = int_to_ptr.hbm [resolvable:$true] %s79_s10 }
   0xe   :  { %57 = dma.hbm_to_vmem [thread:$0]  %s50_s25, 1024, %s52_s28, [#allocation6], %s2393_s17, %s2393_s17, %s2394_s18  }
   0xf   :  { %s2398_s0 = smov [#allocation10]   ;;  %s93_s3 = sshll.u32 %s2491_s8, 4  ;;  %s94_s3 = int_to_ptr.hbm [resolvable:$true] %s93_s3 }
  0x10   :  { %s81_s11 = sshll.u32 %s2398_s0, 4  ;;  %s2399_s14 = smov 512   ;;  %s82_s11 = int_to_ptr.vmem [resolvable:$true] %s81_s11 }
  0x11   :  { %s2400_s15 = smov 32   ;;  %s2401_s16 = smov [#allocation11]  }
  0x12   :  { %87 = dma.hbm_to_vmem [thread:$0]  %s80_s10, 8192, %s82_s11, [#allocation9], %s2399_s14, %s2399_s14, %s2400_s15  }
  0x13   :  { %s95_s19 = sshll.u32 %s2401_s16, 4  ;;  %s96_s19 = int_to_ptr.vmem [resolvable:$true] %s95_s19 }
  0x14   :  { %98 = dma.hbm_to_vmem [thread:$0]  %s94_s3, 128, %s96_s19, [#allocation12]  }
  0x15   :  { %2382 = dma.done.wait [#allocation3], 512  }
  0x16   :  { %2383 = vsyncadd [#allocation3], 4294966784 }
  0x17   :  { %2384 = dma.done.wait [#allocation6], 9216  }
  0x18   :  { %2385 = vsyncadd [#allocation6], 4294958080 }
  0x19   :  { %2386 = dma.done.wait [#allocation9], 9216  }
  0x1a   :  { %2387 = vsyncadd [#allocation9], 4294958080 }
  0x1b   :  { %2388 = dma.done.wait [#allocation12], 128  }
  0x1c   :  { %2389 = vsyncadd [#allocation12], 4294967168  ;;  %v2063_v0 = vld [vmem:[#allocation5 + $0x38] sm:$0xff]  ;;  %v2062_v4 = vld [vmem:[#allocation5 + $0x30] sm:$0xff]  ;;  %s1467_s23 = sshll.u32 %s2492_s9, 4  ;;  %s1468_s23 = int_to_ptr.hbm [resolvable:$true] %s1467_s23 }
  0x1d   :  { %v2071_v1 = vld [vmem:[#allocation5 + $0x78] sm:$0xff]  ;;  %671 = vmatpush.bf16.msra.mxu0 %v2063_v0  ;;  %v2070_v5 = vld [vmem:[#allocation5 + $0x70] sm:$0xff]  ;;  %v2061_v8 = vld [vmem:[#allocation5 + $0x28] sm:$0xff] }
  0x1e   :  { %v2079_v2 = vld [vmem:[#allocation5 + $0xb8] sm:$0xff]  ;;  %684 = vmatpush.bf16.msra.mxu1 %v2071_v1  ;;  %v2078_v6 = vld [vmem:[#allocation5 + $0xb0] sm:$0xff]  ;;  %v2069_v9 = vld [vmem:[#allocation5 + $0x68] sm:$0xff] }
  0x1f   :  { %v2087_v3 = vld [vmem:[#allocation5 + $0xf8] sm:$0xff]  ;;  %697 = vmatpush.bf16.msra.mxu2 %v2079_v2  ;;  %v2086_v7 = vld [vmem:[#allocation5 + $0xf0] sm:$0xff]  ;;  %v2077_v10 = vld [vmem:[#allocation5 + $0xa8] sm:$0xff] }
  0x20   :  { %710 = vmatpush.bf16.msra.mxu3 %v2087_v3  ;;  %v2085_v11 = vld [vmem:[#allocation5 + $0xe8] sm:$0xff]  ;;  %v2060_v12 = vld [vmem:[#allocation5 + $0x20] sm:$0xff]  ;;  %v2059_v16 = vld [vmem:[#allocation5 + $0x18] sm:$0xff] }
  0x21   :  { %672 = vmatpush.bf16.msra.mxu0 %v2062_v4  ;;  %v2068_v13 = vld [vmem:[#allocation5 + $0x60] sm:$0xff]  ;;  %v2067_v17 = vld [vmem:[#allocation5 + $0x58] sm:$0xff]  ;;  %v2058_v20 = vld [vmem:[#allocation5 + $0x10] sm:$0xff] }
  0x22   :  { %685 = vmatpush.bf16.msra.mxu1 %v2070_v5  ;;  %v2076_v14 = vld [vmem:[#allocation5 + $0xa0] sm:$0xff]  ;;  %v2075_v18 = vld [vmem:[#allocation5 + $0x98] sm:$0xff]  ;;  %v2066_v21 = vld [vmem:[#allocation5 + $0x50] sm:$0xff] }
  0x23   :  { %698 = vmatpush.bf16.msra.mxu2 %v2078_v6  ;;  %v2084_v15 = vld [vmem:[#allocation5 + $0xe0] sm:$0xff]  ;;  %v2083_v19 = vld [vmem:[#allocation5 + $0xd8] sm:$0xff]  ;;  %v2074_v22 = vld [vmem:[#allocation5 + $0x90] sm:$0xff] }
  0x24   :  { %711 = vmatpush.bf16.msra.mxu3 %v2086_v7  ;;  %v2082_v23 = vld [vmem:[#allocation5 + $0xd0] sm:$0xff]  ;;  %v2057_v24 = vld [vmem:[#allocation5 + $0x8] sm:$0xff]  ;;  %v123_v29 = vld [vmem:[#allocation2] sm:$0xff] }
  0x25   :  { %673 = vmatpush.bf16.msra.mxu0 %v2061_v8  ;;  %v2065_v25 = vld [vmem:[#allocation5 + $0x48] sm:$0xff]  ;;  %v2056_v30 = vld [vmem:[#allocation5] sm:$0xff]  ;;  %v263_v33 = vunpack.c.l.b16 %v123_v29  ;;  %v264_v37 = vunpack.c.h.b16 %v123_v29  ;;  %v2095_v38 = vld [vmem:[#allocation5 + $0x138] sm:$0xff] }
  0x26   :  { %686 = vmatpush.bf16.msra.mxu1 %v2069_v9  ;;  %v2073_v26 = vld [vmem:[#allocation5 + $0x88] sm:$0xff]  ;;  %v2064_v31 = vld [vmem:[#allocation5 + $0x40] sm:$0xff]  ;;  %v2103_v39 = vld [vmem:[#allocation5 + $0x178] sm:$0xff] }
  0x27   :  { %699 = vmatpush.bf16.msra.mxu2 %v2077_v10  ;;  %v2081_v27 = vld [vmem:[#allocation5 + $0xc8] sm:$0xff]  ;;  %v2072_v34 = vld [vmem:[#allocation5 + $0x80] sm:$0xff]  ;;  %v2111_v40 = vld [vmem:[#allocation5 + $0x1b8] sm:$0xff]  ;;  %v271_v43 = vpack.c.b16 %v263_v33, %v263_v33  ;;  %v272_v45 = vpack.c.b16 %v264_v37, %v264_v37 }
  0x28   :  { %712 = vmatpush.bf16.msra.mxu3 %v2085_v11  ;;  %v124_v28 = vld [vmem:[#allocation2 + $0x8] sm:$0xff]  ;;  %v2080_v35 = vld [vmem:[#allocation5 + $0xc0] sm:$0xff]  ;;  %v2119_v41 = vld [vmem:[#allocation5 + $0x1f8] sm:$0xff] }
  0x29   :  { %674 = vmatpush.bf16.msra.mxu0 %v2060_v12  ;;  %v265_v32 = vunpack.c.l.b16 %v124_v28  ;;  %v266_v36 = vunpack.c.h.b16 %v124_v28  ;;  %v2094_v46 = vld [vmem:[#allocation5 + $0x130] sm:$0xff]  ;;  %v2093_v50 = vld [vmem:[#allocation5 + $0x128] sm:$0xff]  ;;  %v2092_v54 = vld [vmem:[#allocation5 + $0x120] sm:$0xff] }
  0x2a   :  { %687 = vmatpush.bf16.msra.mxu1 %v2068_v13  ;;  %v2102_v47 = vld [vmem:[#allocation5 + $0x170] sm:$0xff]  ;;  %v2101_v51 = vld [vmem:[#allocation5 + $0x168] sm:$0xff]  ;;  %v2100_v55 = vld [vmem:[#allocation5 + $0x160] sm:$0xff] }
  0x2b   :  { %700 = vmatpush.bf16.msra.mxu2 %v2076_v14  ;;  %v273_v42 = vpack.c.b16 %v265_v32, %v265_v32  ;;  %v274_v44 = vpack.c.b16 %v266_v36, %v266_v36  ;;  %v2110_v48 = vld [vmem:[#allocation5 + $0x1b0] sm:$0xff]  ;;  %v2109_v52 = vld [vmem:[#allocation5 + $0x1a8] sm:$0xff]  ;;  %v2108_v56 = vld [vmem:[#allocation5 + $0x1a0] sm:$0xff] }
  0x2c   :  { %713 = vmatpush.bf16.msra.mxu3 %v2084_v15  ;;  %v2118_v49 = vld [vmem:[#allocation5 + $0x1f0] sm:$0xff]  ;;  %v2117_v53 = vld [vmem:[#allocation5 + $0x1e8] sm:$0xff]  ;;  %v2116_v57 = vld [vmem:[#allocation5 + $0x1e0] sm:$0xff] }
  0x2d   :  { %675 = vmatpush.bf16.msra.mxu0 %v2059_v16  ;;  %v2091_v58 = vld [vmem:[#allocation5 + $0x118] sm:$0xff]  ;;  %v2090_v62 = vld [vmem:[#allocation5 + $0x110] sm:$0xff]  ;;  %v2089_v2 = vld [vmem:[#allocation5 + $0x108] sm:$0xff] }
  0x2e   :  { %688 = vmatpush.bf16.msra.mxu1 %v2067_v17  ;;  %v2099_v59 = vld [vmem:[#allocation5 + $0x158] sm:$0xff]  ;;  %v2098_v63 = vld [vmem:[#allocation5 + $0x150] sm:$0xff]  ;;  %v2097_v3 = vld [vmem:[#allocation5 + $0x148] sm:$0xff] }
  0x2f   :  { %701 = vmatpush.bf16.msra.mxu2 %v2075_v18  ;;  %v2107_v60 = vld [vmem:[#allocation5 + $0x198] sm:$0xff]  ;;  %v2106_v0 = vld [vmem:[#allocation5 + $0x190] sm:$0xff]  ;;  %v2105_v5 = vld [vmem:[#allocation5 + $0x188] sm:$0xff] }
  0x30   :  { %714 = vmatpush.bf16.msra.mxu3 %v2083_v19  ;;  %v2115_v61 = vld [vmem:[#allocation5 + $0x1d8] sm:$0xff]  ;;  %v2114_v1 = vld [vmem:[#allocation5 + $0x1d0] sm:$0xff]  ;;  %v2113_v6 = vld [vmem:[#allocation5 + $0x1c8] sm:$0xff] }
  0x31   :  { %676 = vmatpush.bf16.msra.mxu0 %v2058_v20  ;;  %v125_v4 = vld [vmem:[#allocation2 + $0x10] sm:$0xff]  ;;  %v126_v7 = vld [vmem:[#allocation2 + $0x18] sm:$0xff]  ;;  %v2088_v10 = vld [vmem:[#allocation5 + $0x100] sm:$0xff] }
  0x32   :  { %689 = vmatpush.bf16.msra.mxu1 %v2066_v21  ;;  %v267_v8 = vunpack.c.l.b16 %v125_v4  ;;  %v268_v9 = vunpack.c.h.b16 %v125_v4  ;;  %v2096_v11 = vld [vmem:[#allocation5 + $0x140] sm:$0xff]  ;;  %v269_v12 = vunpack.c.l.b16 %v126_v7  ;;  %v270_v13 = vunpack.c.h.b16 %v126_v7  ;;  %v2127_v20 = vld [vmem:[#allocation7 + $0x38] sm:$0xff]  ;;  %v2126_v21 = vld [vmem:[#allocation7 + $0x30] sm:$0xff] }
  0x33   :  { %702 = vmatpush.bf16.msra.mxu2 %v2074_v22  ;;  %v2104_v14 = vld [vmem:[#allocation5 + $0x180] sm:$0xff]  ;;  %v2125_v22 = vld [vmem:[#allocation7 + $0x28] sm:$0xff]  ;;  %v2135_v36 = vld [vmem:[#allocation8 + $0x38] sm:$0xff] }
  0x34   :  { %715 = vmatpush.bf16.msra.mxu3 %v2082_v23  ;;  %v2112_v15 = vld [vmem:[#allocation5 + $0x1c0] sm:$0xff]  ;;  %v275_v16 = vpack.c.b16 %v267_v8, %v267_v8  ;;  %v276_v17 = vpack.c.b16 %v268_v9, %v268_v9  ;;  %v277_v18 = vpack.c.b16 %v269_v12, %v269_v12  ;;  %v278_v19 = vpack.c.b16 %v270_v13, %v270_v13  ;;  %v2121_v28 = vld [vmem:[#allocation7 + $0x8] sm:$0xff] }
  0x35   :  { %677 = vmatpush.bf16.msra.mxu0 %v2057_v24  ;;  %v2124_v23 = vld [vmem:[#allocation7 + $0x20] sm:$0xff]  ;;  %v2123_v24 = vld [vmem:[#allocation7 + $0x18] sm:$0xff]  ;;  %v2193_v9 = vld [vmem:[#allocation10 + $0x1cc] sm:$0xf] }
  0x36   :  { %690 = vmatpush.bf16.msra.mxu1 %v2065_v25  ;;  %v2120_v33 = vld [vmem:[#allocation7] sm:$0xff] }
  0x37   :  { %703 = vmatpush.bf16.msra.mxu2 %v2073_v26  ;;  %v2122_v26 = vld [vmem:[#allocation7 + $0x10] sm:$0xff]  ;;  %v2028_v4 = vld [vmem:[#allocation10 + $0x1e0] sm:$0xf0]  ;;  %v2188_v13 = vld [vmem:[#allocation10 + $0x19c] sm:$0xf0] }
  0x38   :  { %716 = vmatpush.bf16.msra.mxu3 %v2081_v27 }
  0x39   :  { %678 = vmatpush.bf16.msra.mxu0 %v2056_v30 }
  0x3a   :  { %691 = vmatpush.bf16.msra.mxu1 %v2064_v31 }
  0x3b   :  { %704 = vmatpush.bf16.msra.mxu2 %v2072_v34  ;;  %v2211_v34 = vld [vmem:[%s2485_s2] ss:$0 sm:$0xff] }
  0x3c   :  { %717 = vmatpush.bf16.msra.mxu3 %v2080_v35  ;;  %679 = vmatmul.bf16.vlgmr.msra.gmra.mxu0 %v271_v43 }
  0x3d   :  { %723 = vmatpush.bf16.msrb.mxu0 %v2095_v38  ;;  %692 = vmatmul.bf16.vlgmr.msra.gmra.mxu1 %v272_v45  ;;  %v2134_v38 = vld [vmem:[#allocation8 + $0x30] sm:$0xff] }
  0x3e   :  { %736 = vmatpush.bf16.msrb.mxu1 %v2103_v39  ;;  %705 = vmatmul.bf16.vlgmr.msra.gmra.mxu2 %v273_v42  ;;  %v2132_v42 = vld [vmem:[#allocation8 + $0x20] sm:$0xff] }
  0x3f   :  { %749 = vmatpush.bf16.msrb.mxu2 %v2111_v40  ;;  %718 = vmatmul.bf16.vlgmr.msra.gmra.mxu3 %v274_v44  ;;  %v2133_v40 = vld [vmem:[#allocation8 + $0x28] sm:$0xff]  ;;  %v2131_v44 = vld [vmem:[#allocation8 + $0x18] sm:$0xff] }
  0x40   :  { %762 = vmatpush.bf16.msrb.mxu3 %v2119_v41 }
  0x41   :  { %724 = vmatpush.bf16.msrb.mxu0 %v2094_v46 }
  0x42   :  { %737 = vmatpush.bf16.msrb.mxu1 %v2102_v47 }
  0x43   :  { %750 = vmatpush.bf16.msrb.mxu2 %v2110_v48 }
  0x44   :  { %763 = vmatpush.bf16.msrb.mxu3 %v2118_v49  ;;  %v2130_v49 = vld [vmem:[#allocation8 + $0x10] sm:$0xff] }
  0x45   :  { %725 = vmatpush.bf16.msrb.mxu0 %v2093_v50 }
  0x46   :  { %738 = vmatpush.bf16.msrb.mxu1 %v2101_v51 }
  0x47   :  { %751 = vmatpush.bf16.msrb.mxu2 %v2109_v52 }
  0x48   :  { %764 = vmatpush.bf16.msrb.mxu3 %v2117_v53  ;;  %v2129_v53 = vld [vmem:[#allocation8 + $0x8] sm:$0xff] }
  0x49   :  { %726 = vmatpush.bf16.msrb.mxu0 %v2092_v54 }
  0x4a   :  { %739 = vmatpush.bf16.msrb.mxu1 %v2100_v55 }
  0x4b   :  { %752 = vmatpush.bf16.msrb.mxu2 %v2108_v56 }
  0x4c   :  { %765 = vmatpush.bf16.msrb.mxu3 %v2116_v57 }
  0x4d   :  { %727 = vmatpush.bf16.msrb.mxu0 %v2091_v58 }
  0x4e   :  { %740 = vmatpush.bf16.msrb.mxu1 %v2099_v59 }
  0x4f   :  { %753 = vmatpush.bf16.msrb.mxu2 %v2107_v60 }
  0x50   :  { %766 = vmatpush.bf16.msrb.mxu3 %v2115_v61 }
  0x51   :  { %728 = vmatpush.bf16.msrb.mxu0 %v2090_v62 }
  0x52   :  { %741 = vmatpush.bf16.msrb.mxu1 %v2098_v63  ;;  %v2128_v63 = vld [vmem:[#allocation8] sm:$0xff] }
  0x53   :  { %754 = vmatpush.bf16.msrb.mxu2 %v2106_v0  ;;  %v2026_v0 = vld [vmem:[#allocation10 + $0x1c0] sm:$0xf] }
  0x54   :  { %767 = vmatpush.bf16.msrb.mxu3 %v2114_v1  ;;  %v2196_v1 = vld [vmem:[#allocation10 + $0x1dc] sm:$0xf0] }
  0x55   :  { %729 = vmatpush.bf16.msrb.mxu0 %v2089_v2  ;;  %v2192_v2 = vld [vmem:[#allocation10 + $0x1c4] sm:$0xf] }
  0x56   :  { %742 = vmatpush.bf16.msrb.mxu1 %v2097_v3  ;;  %v2027_v3 = vor.u32 %v2196_v1, %v2026_v0  ;;  %v2031_v7 = vor.u32 %v2192_v2, %v2028_v4  ;;  %v1874_v0 = vld [vmem:[#allocation10 + $0x88] sm:$0xf]  ;;  %v2153_v2 = vld [vmem:[#allocation10 + $0x8c] sm:$0xf]  ;;  %v2212_v4 = vld [vmem:[%s2487_s4] ss:$0 sm:$0xff] }
  0x57   :  { %755 = vmatpush.bf16.msrb.mxu2 %v2105_v5  ;;  %v2034_v5 = vld [vmem:[#allocation10 + $0x1c8] sm:$0xf] }
  0x58   :  { %768 = vmatpush.bf16.msrb.mxu3 %v2113_v6  ;;  %v2197_v6 = vld [vmem:[#allocation10 + $0x1e4] sm:$0xf0] }
  0x59   :  { %730 = vmatpush.bf16.msrb.mxu0 %v2088_v10  ;;  %v2035_v8 = vor.u32 %v2197_v6, %v2034_v5  ;;  %v2036_v10 = vld [vmem:[#allocation10 + $0x1e8] sm:$0xf0]  ;;  %v2157_v1 = vld [vmem:[#allocation10 + $0xa4] sm:$0xf0] }
  0x5a   :  { %743 = vmatpush.bf16.msrb.mxu1 %v2096_v11  ;;  %v1994_v11 = vld [vmem:[#allocation10 + $0x180] sm:$0xf]  ;;  %v2039_v12 = vor.u32 %v2193_v9, %v2036_v10  ;;  %v2144_v10 = vld [vmem:[#allocation10 + $0x44] sm:$0xf] }
  0x5b   :  { %756 = vmatpush.bf16.msrb.mxu2 %v2104_v14  ;;  %v2184_v14 = vld [vmem:[#allocation10 + $0x184] sm:$0xf]  ;;  %v2148_v9 = vld [vmem:[#allocation10 + $0x5c] sm:$0xf0] }
  0x5c   :  { %769 = vmatpush.bf16.msrb.mxu3 %v2112_v15  ;;  %731 = vmatmul.bf16.vlgmr.msrb.gmra.mxu0 %v275_v16  ;;  %v1996_v15 = vld [vmem:[#allocation10 + $0x1a0] sm:$0xf0]  ;;  %v1995_v16 = vor.u32 %v2188_v13, %v1994_v11  ;;  %v1842_v13 = vld [vmem:[#allocation10 + $0x48] sm:$0xf] }
  0x5d   :  { %744 = vmatmul.bf16.vlgmr.msrb.gmra.mxu1 %v276_v17  ;;  %847 = vmatpush.bf16.msra.mxu0 %v2127_v20  ;;  %v1999_v17 = vor.u32 %v2184_v14, %v1996_v15  ;;  %v2185_v20 = vld [vmem:[#allocation10 + $0x18c] sm:$0xf]  ;;  %v2149_v14 = vld [vmem:[#allocation10 + $0x64] sm:$0xf0] }
  0x5e   :  { %757 = vmatmul.bf16.vlgmr.msrb.gmra.mxu2 %v277_v18  ;;  %929 = vmatpush.bf16.msra.mxu1 %v2135_v36  ;;  %v2002_v18 = vld [vmem:[#allocation10 + $0x188] sm:$0xf]  ;;  %v2172_v36 = vld [vmem:[#allocation10 + $0x11c] sm:$0xf0]  ;;  %v2145_v15 = vld [vmem:[#allocation10 + $0x4c] sm:$0xf] }
  0x5f   :  { %770 = vmatmul.bf16.vlgmr.msrb.gmra.mxu3 %v278_v19  ;;  %1348 = vmatpush.bf16.msra.mxu2 %v2027_v3  ;;  %v2189_v19 = vld [vmem:[#allocation10 + $0x1a4] sm:$0xf0]  ;;  %v1876_v3 = vld [vmem:[#allocation10 + $0xa8] sm:$0xf0] }
  0x60   :  { %1361 = vmatpush.bf16.msra.mxu3 %v2031_v7  ;;  %v1875_v7 = vor.u32 %v2157_v1, %v1874_v0  ;;  %v1879_v11 = vor.u32 %v2153_v2, %v1876_v3  ;;  %v1980_v1 = vld [vmem:[#allocation10 + $0x170] sm:$0xf0]  ;;  %v1986_v2 = vld [vmem:[#allocation10 + $0x158] sm:$0xf] }
  0x61   :  { %848 = vmatpush.bf16.msra.mxu0 %v2126_v21  ;;  %v2003_v21 = vor.u32 %v2189_v19, %v2002_v18  ;;  %v1802_v18 = vld [vmem:[#allocation10] sm:$0xf]  ;;  %v2183_v3 = vld [vmem:[#allocation10 + $0x174] sm:$0xf0] }
  0x62   :  { %930 = vmatpush.bf16.msra.mxu1 %v2134_v38  ;;  %v2140_v19 = vld [vmem:[#allocation10 + $0x1c] sm:$0xf0] }
  0x63   :  { %1349 = vmatpush.bf16.msra.mxu2 %v1995_v16 }
  0x64   :  { %1362 = vmatpush.bf16.msra.mxu3 %v1999_v17  ;;  %v1844_v17 = vld [vmem:[#allocation10 + $0x68] sm:$0xf0] }
  0x65   :  { %849 = vmatpush.bf16.msra.mxu0 %v2125_v22  ;;  %v2004_v22 = vld [vmem:[#allocation10 + $0x1a8] sm:$0xf0] }
  0x66   :  { %931 = vmatpush.bf16.msra.mxu1 %v2133_v40  ;;  %v1938_v40 = vld [vmem:[#allocation10 + $0x108] sm:$0xf] }
  0x69   :  { %850 = vmatpush.bf16.msra.mxu0 %v2124_v23  ;;  %v1962_v23 = vld [vmem:[#allocation10 + $0x140] sm:$0xf] }
  0x6a   :  { %932 = vmatpush.bf16.msra.mxu1 %v2132_v42  ;;  %v2169_v42 = vld [vmem:[#allocation10 + $0x10c] sm:$0xf] }
  0x6d   :  { %851 = vmatpush.bf16.msra.mxu0 %v2123_v24  ;;  %v2180_v24 = vld [vmem:[#allocation10 + $0x15c] sm:$0xf0] }
  0x6e   :  { %933 = vmatpush.bf16.msra.mxu1 %v2131_v44 }
  0x71   :  { %852 = vmatpush.bf16.msra.mxu0 %v2122_v26  ;;  %v2176_v26 = vld [vmem:[#allocation10 + $0x144] sm:$0xf] }
  0x72   :  { %934 = vmatpush.bf16.msra.mxu1 %v2130_v49  ;;  %v2160_v49 = vld [vmem:[#allocation10 + $0xc4] sm:$0xf] }
  0x75   :  { %853 = vmatpush.bf16.msra.mxu0 %v2121_v28  ;;  %v1970_v28 = vld [vmem:[#allocation10 + $0x148] sm:$0xf] }
  0x76   :  { %935 = vmatpush.bf16.msra.mxu1 %v2129_v53  ;;  %v2165_v53 = vld [vmem:[#allocation10 + $0xe4] sm:$0xf0] }
  0x79   :  { %854 = vmatpush.bf16.msra.mxu0 %v2120_v33 }
  0x7a   :  { %936 = vmatpush.bf16.msra.mxu1 %v2128_v63  ;;  %v1868_v63 = vld [vmem:[#allocation10 + $0xa0] sm:$0xf0] }
  0x7d   :  { %1374 = vmatpush.bf16.msrb.mxu0 %v2035_v8  ;;  %v1834_v8 = vld [vmem:[#allocation10 + $0x40] sm:$0xf] }
  0x7e   :  { %1387 = vmatpush.bf16.msrb.mxu1 %v2039_v12  ;;  %v1836_v12 = vld [vmem:[#allocation10 + $0x60] sm:$0xf0]  ;;  %v1835_v16 = vor.u32 %v2148_v9, %v1834_v8  ;;  %v1946_v9 = vld [vmem:[#allocation10 + $0x110] sm:$0xf] }
  0x81   :  { %1375 = vmatpush.bf16.msrb.mxu0 %v2003_v21  ;;  %v1839_v21 = vor.u32 %v2144_v10, %v1836_v12  ;;  %v2174_v10 = vld [vmem:[#allocation10 + $0x12c] sm:$0xf0] }
  0x82   :  { %v1947_v12 = vor.u32 %v2174_v10, %v1946_v9 }
  0xb9   :  { %v680_v25 = vpop.f32.mrf.mxu0 }
  0xba   :  { %v693_v27 = vpop.f32.mrf.mxu1  ;;  %v681_v39 = vadd.f32 %v2211_v34, %v680_v25  ;;  %v2007_v25 = vor.u32 %v2185_v20, %v2004_v22  ;;  %v1843_v22 = vor.u32 %v2149_v14, %v1842_v13  ;;  %v1948_v13 = vld [vmem:[#allocation10 + $0x130] sm:$0xf0]  ;;  %v1954_v14 = vld [vmem:[#allocation10 + $0x118] sm:$0xf] }
  0xbc   :  { %v694_v41 = vadd.f32 %v693_v27, %v681_v39  ;;  %v1964_v27 = vld [vmem:[#allocation10 + $0x160] sm:$0xf0]  ;;  %1388 = vmatpush.bf16.msrb.mxu1 %v2007_v25  ;;  %v1810_v25 = vld [vmem:[#allocation10 + $0x8] sm:$0xf] }
  0xbd   :  { %v1967_v33 = vor.u32 %v2176_v26, %v1964_v27  ;;  %v1932_v39 = vld [vmem:[#allocation10 + $0x120] sm:$0xf0]  ;;  %v2141_v27 = vld [vmem:[#allocation10 + $0x24] sm:$0xf0] }
  0xbf   :  { %1363 = vmatpush.bf16.msra.mxu3 %v1967_v33  ;;  %v2044_v33 = vld [vmem:[#allocation10 + $0x1f0] sm:$0xf0] }
  0xc1   :  { %v706_v29 = vpop.f32.mrf.mxu2  ;;  %v682_v31 = vpop.f32.mrf.mxu0 }
  0xc2   :  { %v719_v30 = vpop.f32.mrf.mxu3  ;;  %v695_v32 = vpop.f32.mrf.mxu1  ;;  %v707_v43 = vadd.f32 %v706_v29, %v694_v41  ;;  %v1963_v29 = vor.u32 %v2180_v24, %v1962_v23  ;;  %v2177_v31 = vld [vmem:[#allocation10 + $0x14c] sm:$0xf]  ;;  %v2173_v41 = vld [vmem:[#allocation10 + $0x124] sm:$0xf0]  ;;  %v2136_v23 = vld [vmem:[#allocation10 + $0x4] sm:$0xf] }
  0xc3   :  { %v1972_v32 = vld [vmem:[#allocation10 + $0x168] sm:$0xf0]  ;;  %v1804_v24 = vld [vmem:[#allocation10 + $0x20] sm:$0xf0] }
  0xc4   :  { %v720_v45 = vadd.f32 %v719_v30, %v707_v43  ;;  %v2181_v30 = vld [vmem:[#allocation10 + $0x164] sm:$0xf0]  ;;  %v1975_v38 = vor.u32 %v2177_v31, %v1972_v32  ;;  %v1940_v43 = vld [vmem:[#allocation10 + $0x128] sm:$0xf0]  ;;  %1350 = vmatpush.bf16.msra.mxu2 %v1963_v29  ;;  %v2042_v29 = vld [vmem:[#allocation10 + $0x1d0] sm:$0xf] }
  0xc5   :  { %v1971_v34 = vor.u32 %v2181_v30, %v1970_v28  ;;  %v2137_v28 = vld [vmem:[#allocation10 + $0xc] sm:$0xf]  ;;  %v1847_v30 = vor.u32 %v2145_v15, %v1844_v17  ;;  %v2198_v31 = vld [vmem:[#allocation10 + $0x1ec] sm:$0xf0]  ;;  %v2194_v32 = vld [vmem:[#allocation10 + $0x1d4] sm:$0xf] }
  0xc6   :  { %1389 = vmatpush.bf16.msrb.mxu1 %v1975_v38  ;;  %v2199_v38 = vld [vmem:[#allocation10 + $0x1f4] sm:$0xf0] }
  0xc7   :  { %1376 = vmatpush.bf16.msrb.mxu0 %v1971_v34  ;;  %v2175_v15 = vld [vmem:[#allocation10 + $0x134] sm:$0xf0] }
  0xc8   :  { %v1955_v17 = vor.u32 %v2175_v15, %v1954_v14 }
  0xc9   :  { %v708_v35 = vpop.f32.mrf.mxu2 }
  0xca   :  { %v721_v37 = vpop.f32.mrf.mxu3  ;;  %v1930_v35 = vld [vmem:[#allocation10 + $0x100] sm:$0xf] }
  0xcb   :  { %v2168_v37 = vld [vmem:[#allocation10 + $0x104] sm:$0xf]  ;;  %v1931_v44 = vor.u32 %v2172_v36, %v1930_v35  ;;  %v1803_v35 = vor.u32 %v2140_v19, %v1802_v18  ;;  %v1812_v36 = vld [vmem:[#allocation10 + $0x28] sm:$0xf0]  ;;  %v2171_v18 = vld [vmem:[#allocation10 + $0x11c] sm:$0xf] }
  0xcc   :  { %v1956_v19 = vld [vmem:[#allocation10 + $0x138] sm:$0xf0] }
  0xcd   :  { %1351 = vmatpush.bf16.msra.mxu2 %v1931_v44  ;;  %v2047_v44 = vor.u32 %v2194_v32, %v2044_v33  ;;  %v1882_v32 = vld [vmem:[#allocation10 + $0x90] sm:$0xf] }
  0xd9   :  { %v732_v46 = vpop.f32.mrf.mxu0 }
  0xda   :  { %v745_v47 = vpop.f32.mrf.mxu1  ;;  %v733_v48 = vadd.f32 %v732_v46, %v720_v45  ;;  %v1935_v45 = vor.u32 %v2168_v37, %v1932_v39  ;;  %v1939_v46 = vor.u32 %v2173_v41, %v1938_v40  ;;  %v2050_v37 = vld [vmem:[#allocation10 + $0x1d8] sm:$0xf]  ;;  %v1807_v39 = vor.u32 %v2136_v23, %v1804_v24  ;;  %v2195_v41 = vld [vmem:[#allocation10 + $0x1dc] sm:$0xf]  ;;  %v2162_v23 = vld [vmem:[#allocation10 + $0xd4] sm:$0xf] }
  0xdb   :  { %v1811_v40 = vor.u32 %v2141_v27, %v1810_v25  ;;  %v1916_v25 = vld [vmem:[#allocation10 + $0xf0] sm:$0xf0]  ;;  %v2167_v27 = vld [vmem:[#allocation10 + $0xf4] sm:$0xf0] }
  0xdc   :  { %v746_v50 = vadd.f32 %v745_v47, %v733_v48  ;;  %v1898_v47 = vld [vmem:[#allocation10 + $0xc0] sm:$0xf]  ;;  %1364 = vmatpush.bf16.msra.mxu3 %v1935_v45  ;;  %1377 = vmatpush.bf16.msrb.mxu0 %v1939_v46  ;;  %v2010_v45 = vld [vmem:[#allocation10 + $0x190] sm:$0xf]  ;;  %v1815_v46 = vor.u32 %v2137_v28, %v1812_v36  ;;  %v1919_v28 = vor.u32 %v2162_v23, %v1916_v25  ;;  %v1884_v36 = vld [vmem:[#allocation10 + $0xb0] sm:$0xf0] }
  0xdd   :  { %v2164_v48 = vld [vmem:[#allocation10 + $0xdc] sm:$0xf0] }
  0xe1   :  { %v758_v51 = vpop.f32.mrf.mxu2  ;;  %v734_v55 = vpop.f32.mrf.mxu0 }
  0xe2   :  { %v771_v52 = vpop.f32.mrf.mxu3  ;;  %v759_v54 = vadd.f32 %v758_v51, %v746_v50  ;;  %v747_v56 = vpop.f32.mrf.mxu1  ;;  %v1943_v50 = vor.u32 %v2169_v42, %v1940_v43  ;;  %v1900_v51 = vld [vmem:[#allocation10 + $0xe0] sm:$0xf0]  ;;  %v1908_v55 = vld [vmem:[#allocation10 + $0xe8] sm:$0xf0]  ;;  %v2052_v42 = vld [vmem:[#allocation10 + $0x1f8] sm:$0xf0]  ;;  %v2043_v43 = vor.u32 %v2198_v31, %v2042_v29 }
  0xe3   :  { %v1899_v56 = vor.u32 %v2164_v48, %v1898_v47  ;;  %v2051_v47 = vor.u32 %v2199_v38, %v2050_v37  ;;  %v2190_v48 = vld [vmem:[#allocation10 + $0x1ac] sm:$0xf0]  ;;  %v1924_v31 = vld [vmem:[#allocation10 + $0xf8] sm:$0xf0] }
  0xe4   :  { %v772_v57 = vadd.f32 %v771_v52, %v759_v54  ;;  %v1906_v52 = vld [vmem:[#allocation10 + $0xc8] sm:$0xf]  ;;  %v2161_v54 = vld [vmem:[#allocation10 + $0xcc] sm:$0xf]  ;;  %1390 = vmatpush.bf16.msrb.mxu1 %v1943_v50  ;;  %v2012_v50 = vld [vmem:[#allocation10 + $0x1b0] sm:$0xf0] }
  0xe5   :  { %1352 = vmatpush.bf16.msra.mxu2 %v1899_v56  ;;  %v2020_v56 = vld [vmem:[#allocation10 + $0x1b8] sm:$0xf0] }
  0xe6   :  { %vm775_vm0 = vcmp.ge.f32.partialorder %v772_v57, 0.0  ;;  %v776_v58 = vmul.f32 0.01, %v772_v57 }
  0xe8   :  { %v777_v59 = vsel %vm775_vm0, %v772_v57, %v776_v58  ;;  %v1903_v57 = vor.u32 %v2160_v49, %v1900_v51  ;;  %v1907_v58 = vor.u32 %v2165_v53, %v1906_v52  ;;  %v2186_v49 = vld [vmem:[#allocation10 + $0x194] sm:$0xf]  ;;  %v2055_v51 = vor.u32 %v2195_v41, %v2052_v42  ;;  %v2018_v52 = vld [vmem:[#allocation10 + $0x198] sm:$0xf]  ;;  %v2155_v41 = vld [vmem:[#allocation10 + $0x9c] sm:$0xf] }
  0xe9   :  { %v778_v60 = vpack.c.bf16 %v777_v59, %v777_v59  ;;  %v760_v61 = vpop.f32.mrf.mxu2  ;;  %v1866_v59 = vld [vmem:[#allocation10 + $0x80] sm:$0xf]  ;;  %v2191_v53 = vld [vmem:[#allocation10 + $0x1b4] sm:$0xf0] }
  0xea   :  { %v773_v62 = vpop.f32.mrf.mxu3  ;;  %v2152_v61 = vld [vmem:[#allocation10 + $0x84] sm:$0xf]  ;;  %1365 = vmatpush.bf16.msra.mxu3 %v1903_v57  ;;  %1378 = vmatpush.bf16.msrb.mxu0 %v1907_v58  ;;  %v2011_v57 = vor.u32 %v2190_v48, %v2010_v45  ;;  %v2015_v58 = vor.u32 %v2186_v49, %v2012_v50  ;;  %v2150_v45 = vld [vmem:[#allocation10 + $0x6c] sm:$0xf0]  ;;  %v1852_v48 = vld [vmem:[#allocation10 + $0x70] sm:$0xf0] }
  0xeb   :  { %855 = vmatmul.bf16.vlgmr.msra.gmra.mxu0 %v778_v60  ;;  %v2156_v60 = vld [vmem:[#allocation10 + $0x9c] sm:$0xf0]  ;;  %v1911_v62 = vor.u32 %v2161_v54, %v1908_v55  ;;  %v1871_v6 = vor.u32 %v2152_v61, %v1868_v63  ;;  %v2187_v55 = vld [vmem:[#allocation10 + $0x19c] sm:$0xf]  ;;  %v1978_v61 = vld [vmem:[#allocation10 + $0x150] sm:$0xf] }
  0xec   :  { %v1867_v5 = vor.u32 %v2156_v60, %v1866_v59  ;;  %v2019_v59 = vor.u32 %v2191_v53, %v2018_v52  ;;  %v2023_v60 = vor.u32 %v2187_v55, %v2020_v56  ;;  %v2178_v63 = vld [vmem:[#allocation10 + $0x154] sm:$0xf]  ;;  %v1858_v49 = vld [vmem:[#allocation10 + $0x58] sm:$0xf]  ;;  %v2147_v52 = vld [vmem:[#allocation10 + $0x5c] sm:$0xf] }
  0xed   :  { %1391 = vmatpush.bf16.msrb.mxu1 %v1911_v62  ;;  %v2182_v62 = vld [vmem:[#allocation10 + $0x16c] sm:$0xf0]  ;;  %v1860_v53 = vld [vmem:[#allocation10 + $0x78] sm:$0xf0] }
  0xee   :  { %1353 = vmatpush.bf16.msra.mxu2 %v1867_v5  ;;  %1366 = vmatpush.bf16.msra.mxu3 %v1871_v6  ;;  %v1979_v0 = vor.u32 %v2182_v62, %v1978_v61  ;;  %v1987_v5 = vor.u32 %v2183_v3, %v1986_v2  ;;  %v2179_v6 = vld [vmem:[#allocation10 + $0x15c] sm:$0xf]  ;;  %v1818_v56 = vld [vmem:[#allocation10 + $0x10] sm:$0xf]  ;;  %v1826_v61 = vld [vmem:[#allocation10 + $0x18] sm:$0xf] }
  0xef   :  { %1379 = vmatpush.bf16.msrb.mxu0 %v1875_v7  ;;  %v1988_v7 = vld [vmem:[#allocation10 + $0x178] sm:$0xf0]  ;;  %v2143_v62 = vld [vmem:[#allocation10 + $0x34] sm:$0xf0] }
  0xf0   :  { %v1991_v8 = vor.u32 %v2179_v6, %v1988_v7  ;;  %v1827_v3 = vor.u32 %v2143_v62, %v1826_v61 }
  0xf1   :  { %1392 = vmatpush.bf16.msrb.mxu1 %v1879_v11  ;;  %v2170_v11 = vld [vmem:[#allocation10 + $0x114] sm:$0xf] }
  0xf2   :  { %1354 = vmatpush.bf16.msra.mxu2 %v1835_v16  ;;  %1367 = vmatpush.bf16.msra.mxu3 %v1839_v21  ;;  %v1951_v16 = vor.u32 %v2170_v11, %v1948_v13  ;;  %v1914_v21 = vld [vmem:[#allocation10 + $0xd0] sm:$0xf] }
  0xf3   :  { %1380 = vmatpush.bf16.msrb.mxu0 %v1843_v22  ;;  %v2166_v22 = vld [vmem:[#allocation10 + $0xec] sm:$0xf0] }
  0xf4   :  { %v1915_v24 = vor.u32 %v2166_v22, %v1914_v21 }
  0xf5   :  { %1393 = vmatpush.bf16.msrb.mxu1 %v1847_v30  ;;  %v2163_v30 = vld [vmem:[#allocation10 + $0xdc] sm:$0xf] }
  0xf6   :  { %1355 = vmatpush.bf16.msra.mxu2 %v1803_v35  ;;  %1368 = vmatpush.bf16.msra.mxu3 %v1807_v39  ;;  %v1927_v33 = vor.u32 %v2163_v30, %v1924_v31  ;;  %v2154_v35 = vld [vmem:[#allocation10 + $0x94] sm:$0xf]  ;;  %v1890_v39 = vld [vmem:[#allocation10 + $0x98] sm:$0xf] }
  0xf7   :  { %1381 = vmatpush.bf16.msrb.mxu0 %v1811_v40  ;;  %v1887_v38 = vor.u32 %v2154_v35, %v1884_v36  ;;  %v2159_v40 = vld [vmem:[#allocation10 + $0xb4] sm:$0xf0] }
  0xf8   :  { %v1891_v42 = vor.u32 %v2159_v40, %v1890_v39 }
  0xf9   :  { %1394 = vmatpush.bf16.msrb.mxu1 %v1815_v46 }
  0xfa   :  { %1400 = vmatpush.bf16.msrb.mxu2 %v2043_v43  ;;  %1413 = vmatpush.bf16.msrb.mxu3 %v2047_v44  ;;  %v1892_v43 = vld [vmem:[#allocation10 + $0xb8] sm:$0xf0]  ;;  %v1850_v44 = vld [vmem:[#allocation10 + $0x50] sm:$0xf] }
  0xfb   :  { %1426 = vmatpush.bf16.msra.mxu0 %v2051_v47  ;;  %v1895_v46 = vor.u32 %v2155_v41, %v1892_v43  ;;  %v2146_v47 = vld [vmem:[#allocation10 + $0x54] sm:$0xf]  ;;  %v1851_v50 = vor.u32 %v2150_v45, %v1850_v44 }
  0xfe   :  { %1401 = vmatpush.bf16.msrb.mxu2 %v2011_v57  ;;  %1414 = vmatpush.bf16.msrb.mxu3 %v2015_v58  ;;  %v2142_v57 = vld [vmem:[#allocation10 + $0x2c] sm:$0xf0]  ;;  %v2138_v58 = vld [vmem:[#allocation10 + $0x14] sm:$0xf] }
  0xff   :  { %1427 = vmatpush.bf16.msra.mxu0 %v2019_v59  ;;  %v1863_v59 = vor.u32 %v2147_v52, %v1860_v53 }
 0x102   :  { %1402 = vmatpush.bf16.msrb.mxu2 %v1979_v0  ;;  %v1828_v0 = vld [vmem:[#allocation10 + $0x38] sm:$0xf0] }
 0x103   :  { %1428 = vmatpush.bf16.msra.mxu0 %v1987_v5  ;;  %v2213_v5 = vld [vmem:[%s2489_s6] ss:$0 sm:$0xff]  ;;  %s2402_s6 = smov [#allocation13]  }
 0x104   :  { %s1465_s20 = sshll.u32 %s2402_s6, 4  ;;  %s1466_s20 = int_to_ptr.vmem [resolvable:$true] %s1465_s20 }
 0x106   :  { %1403 = vmatpush.bf16.msrb.mxu2 %v1947_v12  ;;  %v1010_v12 = vld [vmem:[#allocation11] sm:$0xff] }
 0x107   :  { %1429 = vmatpush.bf16.msra.mxu0 %v1955_v17  ;;  %v1014_v13 = vperm.slane %v1010_v12, 2  ;;  %v1015_v14 = vperm.slane %v1010_v12, 3  ;;  %v1019_v30 = vperm.slane %v1010_v12, 7  ;;  %v1016_v35 = vperm.slane %v1010_v12, 4 }
 0x108   :  { %v1017_v36 = vperm.slane %v1010_v12, 5 }
 0x10a   :  { %1404 = vmatpush.bf16.msrb.mxu2 %v1915_v24 }
 0x168   :  { %v856_v20 = vpop.f32.mrf.mxu0 }
 0x169   :  { %v857_v26 = vadd.f32 %v2212_v4, %v856_v20  ;;  %v1983_v4 = vor.u32 %v2178_v63, %v1980_v1  ;;  %v1959_v20 = vor.u32 %v2171_v18, %v1956_v19  ;;  %v2139_v63 = vld [vmem:[#allocation10 + $0x1c] sm:$0xf]  ;;  %v1819_v1 = vor.u32 %v2142_v57, %v1818_v56 }
 0x16a   :  { %v1012_v19 = vperm.slane %v1010_v12, 0 }
 0x16b   :  { %v860_v34 = vpack.c.bf16 %v857_v26, %v857_v26  ;;  %1415 = vmatpush.bf16.msrb.mxu3 %v1983_v4  ;;  %v1922_v26 = vld [vmem:[#allocation10 + $0xd8] sm:$0xf]  ;;  %v1831_v4 = vor.u32 %v2139_v63, %v1828_v0 }
 0x16c   :  { %v1923_v29 = vor.u32 %v2167_v27, %v1922_v26 }
 0x16d   :  { %937 = vmatmul.bf16.vlgmr.msra.gmra.mxu1 %v860_v34  ;;  %v2158_v34 = vld [vmem:[#allocation10 + $0xac] sm:$0xf0] }
 0x16e   :  { %1439 = vmatpush.bf16.msra.mxu1 %v2055_v51  ;;  %1430 = vmatpush.bf16.msra.mxu0 %v1923_v29  ;;  %v1883_v37 = vor.u32 %v2158_v34, %v1882_v32  ;;  %v2151_v51 = vld [vmem:[#allocation10 + $0x74] sm:$0xf0]  ;;  %v1018_v29 = vperm.slane %v1010_v12, 6 }
 0x16f   :  { %1416 = vmatpush.bf16.msrb.mxu3 %v1951_v16  ;;  %v1859_v55 = vor.u32 %v2151_v51, %v1858_v49 }
 0x170   :  { %v858_v54 = vpop.f32.mrf.mxu0  ;;  %1405 = vmatpush.bf16.msrb.mxu2 %v1883_v37 }
 0x171   :  { %v1855_v54 = vor.u32 %v2146_v47, %v1852_v48 }
 0x172   :  { %1440 = vmatpush.bf16.msra.mxu1 %v2023_v60  ;;  %1431 = vmatpush.bf16.msra.mxu0 %v1891_v42  ;;  %v1820_v60 = vld [vmem:[#allocation10 + $0x30] sm:$0xf0] }
 0x173   :  { %1417 = vmatpush.bf16.msrb.mxu3 %v1919_v28  ;;  %v1823_v2 = vor.u32 %v2138_v58, %v1820_v60 }
 0x174   :  { %1406 = vmatpush.bf16.msrb.mxu2 %v1851_v50 }
 0x176   :  { %1441 = vmatpush.bf16.msra.mxu1 %v1991_v8  ;;  %1432 = vmatpush.bf16.msra.mxu0 %v1859_v55 }
 0x177   :  { %1418 = vmatpush.bf16.msrb.mxu3 %v1887_v38 }
 0x178   :  { %1407 = vmatpush.bf16.msrb.mxu2 %v1819_v1 }
 0x17a   :  { %1442 = vmatpush.bf16.msra.mxu1 %v1959_v20  ;;  %1433 = vmatpush.bf16.msra.mxu0 %v1827_v3  ;;  %v1013_v20 = vperm.slane %v1010_v12, 1 }
 0x17b   :  { %1419 = vmatpush.bf16.msrb.mxu3 %v1855_v54 }
 0x17e   :  { %1443 = vmatpush.bf16.msra.mxu1 %v1927_v33 }
 0x17f   :  { %1420 = vmatpush.bf16.msrb.mxu3 %v1823_v2 }
 0x182   :  { %1444 = vmatpush.bf16.msra.mxu1 %v1895_v46 }
 0x186   :  { %1445 = vmatpush.bf16.msra.mxu1 %v1863_v59 }
 0x18a   :  { %1446 = vmatpush.bf16.msra.mxu1 %v1831_v4 }
 0x1ea   :  { %v938_v6 = vpop.f32.mrf.mxu1 }
 0x1eb   :  { %v939_v7 = vadd.f32 %v2213_v5, %v938_v6 }
 0x1ed   :  { %vm942_vm1 = vcmp.ge.f32.partialorder %v939_v7, 0.0  ;;  %v943_v8 = vmul.f32 0.01, %v939_v7 }
 0x1ef   :  { %v944_v9 = vsel %vm942_vm1, %v939_v7, %v943_v8 }
 0x1f0   :  { %v945_v10 = vpack.c.bf16 %v944_v9, %v944_v9 }
 0x1f2   :  { %v940_v11 = vpop.f32.mrf.mxu1  ;;  %1356 = vmatmul.bf16.vlgmr.msra.gmra.mxu2 %v945_v10  ;;  %1369 = vmatmul.bf16.vlgmr.msra.gmra.mxu3 %v945_v10 }
 0x1f3   :  { %1382 = vmatmul.bf16.vlgmr.msrb.gmra.mxu0 %v945_v10  ;;  %1395 = vmatmul.bf16.vlgmr.msrb.gmra.mxu1 %v945_v10 }
 0x202   :  { %1408 = vmatmul.bf16.vlgmr.msrb.gmra.mxu2 %v945_v10  ;;  %1421 = vmatmul.bf16.vlgmr.msrb.gmra.mxu3 %v945_v10 }
 0x203   :  { %1434 = vmatmul.bf16.vlgmr.msra.gmra.mxu0 %v945_v10  ;;  %1447 = vmatmul.bf16.vlgmr.msra.gmra.mxu1 %v945_v10 }
 0x270   :  { %v1383_v15 = vpop.f32.mrf.mxu0  ;;  %v1396_v16 = vpop.f32.mrf.mxu1 }
 0x271   :  { %v1384_v17 = vadd.f32 %v1383_v15, %v1014_v13  ;;  %v1397_v18 = vadd.f32 %v1396_v16, %v1015_v14 }
 0x273   :  { %1454 = vst [vmem:[#allocation13 + $0x10] sm:$0xff] %v1384_v17 }
 0x274   :  { %1455 = vst [vmem:[#allocation13 + $0x18] sm:$0xff] %v1397_v18 }
 0x275   :  { %v1357_v21 = vpop.f32.mrf.mxu2  ;;  %v1370_v22 = vpop.f32.mrf.mxu3 }
 0x276   :  { %v1358_v23 = vadd.f32 %v1357_v21, %v1012_v19  ;;  %v1371_v24 = vadd.f32 %v1370_v22, %v1013_v20 }
 0x278   :  { %1452 = vst [vmem:[#allocation13] sm:$0xff] %v1358_v23  ;;  %v1385_v25 = vpop.f32.mrf.mxu0  ;;  %v1398_v26 = vpop.f32.mrf.mxu1 }
 0x279   :  { %1453 = vst [vmem:[#allocation13 + $0x8] sm:$0xff] %v1371_v24 }
 0x27d   :  { %v1359_v27 = vpop.f32.mrf.mxu2  ;;  %v1372_v28 = vpop.f32.mrf.mxu3 }
 0x280   :  { %v1435_v31 = vpop.f32.mrf.mxu0  ;;  %v1448_v32 = vpop.f32.mrf.mxu1 }
 0x281   :  { %v1436_v33 = vadd.f32 %v1435_v31, %v1018_v29  ;;  %v1449_v34 = vadd.f32 %v1448_v32, %v1019_v30 }
 0x283   :  { %1458 = vst [vmem:[#allocation13 + $0x30] sm:$0xff] %v1436_v33 }
 0x284   :  { %1459 = vst [vmem:[#allocation13 + $0x38] sm:$0xff] %v1449_v34 }
 0x285   :  { %v1409_v37 = vpop.f32.mrf.mxu2  ;;  %v1422_v38 = vpop.f32.mrf.mxu3 }
 0x286   :  { %v1410_v39 = vadd.f32 %v1409_v37, %v1016_v35  ;;  %v1423_v40 = vadd.f32 %v1422_v38, %v1017_v36 }
 0x288   :  { %1456 = vst [vmem:[#allocation13 + $0x20] sm:$0xff] %v1410_v39  ;;  %v1437_v41 = vpop.f32.mrf.mxu0  ;;  %v1450_v42 = vpop.f32.mrf.mxu1 }
 0x289   :  { %1457 = vst [vmem:[#allocation13 + $0x28] sm:$0xff] %v1423_v40 }
 0x28a   :  { %1470 = dma.vmem_to_hbm [thread:$0]  %s1466_s20, 1024, %s1468_s23, [#allocation4]  }
 0x28d   :  { %v1411_v43 = vpop.f32.mrf.mxu2  ;;  %v1424_v44 = vpop.f32.mrf.mxu3 }
 0x28e   :  { %2390 = dma.done.wait [#allocation4], 1024  }
 0x28f   :  { %2391 = vsyncadd [#allocation4], 4294966272 }
 0x290   :  { %1475 = vsyncpa [#allocation3], 1 }
 0x291   :  { %1476 = vsyncpa [#allocation6], 1 }
 0x292   :  { %1477 = vsyncpa [#allocation9], 1 }
 0x293   :  { %1478 = vsyncpa [#allocation12], 1 }
 0x294   :  { %1479 = vsyncpa [#allocation4], 1 }

</bundles_post_ra>
